<compile_context>
chip_gen: v6e
topology: v6e:2x2x1
jax: 0.10.0
libtpu: 0.0.40
codegen_flags: <defaults>
</compile_context>

<pallas_src>
import jax
import jax.numpy as jnp
from jax.experimental import pallas as pl
from jax.experimental.pallas import tpu as pltpu


def _sublane_packing(itemsize: int) -> int:
    # Rows per vreg sublane tile: 8 for 4-byte dtypes, 16 for bf16, 32 for 8-bit.
    return max(8, 32 // itemsize)


def _round_up(x: int, m: int) -> int:
    return -(-x // m) * m


def _tpu_budget():
    """Returns (target_block_bytes, vmem_limit_bytes), generation-aware.

    v5e / v6e: 128 MiB physical VMEM per TensorCore -> big blocks so the fixed
    ~0.35us/grid-step overhead amortizes and each DMA is long.
    v7x: only 64 MiB per TensorCore -> stay near 8 MiB blocks / 40 MiB limit so
    the double-buffered pipeline still fits.
    """
    vmem_bytes = None
    try:
        info = pltpu.get_tpu_info()
        vmem_bytes = getattr(info, "vmem_capacity_bytes", None)
    except Exception:
        vmem_bytes = None
    if vmem_bytes is not None and vmem_bytes >= (96 << 20):
        return 20 << 20, 64 << 20   # v5e / v6e class parts
    return 8 << 20, 40 << 20        # v7x (or unknown): conservative


def _choose_tiles(nc: int, hw: int, itemsize: int, target_block_bytes: int):
    packing = _sublane_packing(itemsize)
    rows_needed = _round_up(nc, packing)

    if packing * hw * itemsize <= target_block_bytes:
        # Whole reduction extent fits in one block even at minimum row height.
        hw_tile = hw
    else:
        # Tile the reduction axis in multiples of 128 lanes.
        hw_tile = (target_block_bytes // (packing * itemsize)) // 128 * 128
        hw_tile = max(128, min(hw_tile, (hw // 128) * 128))

    # Fill the block-byte budget with rows (no artificial cap).  The +16 term
    # budgets the per-row output block + f32 accumulator so degenerate tiny-HW
    # shapes cannot blow VMEM.
    row_tile = target_block_bytes // (hw_tile * itemsize + 16)
    row_tile = max(packing, (row_tile // packing) * packing)
    row_tile = min(row_tile, rows_needed)

    # Keep >= 2 programs along the parallel (row) axis whenever nc permits so
    # both TensorCores contribute HBM bandwidth on megacore parts (v7x).
    if rows_needed >= 2 * packing and -(-rows_needed // row_tile) < 2:
        row_tile = _round_up(-(-rows_needed // 2), packing)

    return row_tile, hw_tile


def _make_gap_kernel(hw: int, hw_tile: int):
    inv_hw = 1.0 / float(hw)
    ragged_hw = (hw % hw_tile) != 0   # static: only the tail block needs a mask

    def _accumulate(x_ref, acc_ref, j, mask_tail: bool):
        x = x_ref[...].astype(jnp.float32)
        if mask_tail:
            col = j * hw_tile + jax.lax.broadcasted_iota(jnp.int32, x.shape, 1)
            x = jnp.where(col < hw, x, 0.0)
        acc_ref[...] += jnp.sum(x, axis=-1, keepdims=True)

    def kernel(x_ref, o_ref, acc_ref):
        j = pl.program_id(1)
        nj = pl.num_programs(1)

        @pl.when(j == 0)
        def _init():
            acc_ref[...] = jnp.zeros_like(acc_ref)

        if ragged_hw:
            # Hot path: pure load + sum.  Masking only on the tail block.
            @pl.when(j < nj - 1)
            def _body():
                _accumulate(x_ref, acc_ref, j, mask_tail=False)

            @pl.when(j == nj - 1)
            def _tail():
                _accumulate(x_ref, acc_ref, j, mask_tail=True)
        else:
            _accumulate(x_ref, acc_ref, j, mask_tail=False)

        @pl.when(j == nj - 1)
        def _finalize():
            o_ref[...] = (acc_ref[...] * inv_hw).astype(o_ref.dtype)

    return kernel


def global_avg_pool2d(x: jax.Array) -> jax.Array:
    """Equivalent of F.avg_pool2d(x, kernel_size=x.shape[2:]) for NCHW input.

    Returns an array of shape (N, C, 1, 1) with the same dtype as x.
    """
    n, c, h, w = x.shape
    nc, hw = n * c, h * w
    itemsize = jnp.dtype(x.dtype).itemsize

    target_block_bytes, vmem_limit_bytes = _tpu_budget()
    row_tile, hw_tile = _choose_tiles(nc, hw, itemsize, target_block_bytes)
    grid = (pl.cdiv(nc, row_tile), pl.cdiv(hw, hw_tile))

    x2d = x.reshape(nc, hw)   # contiguous reshape: no HBM copy, no padding

    out2d = pl.pallas_call(
        _make_gap_kernel(hw, hw_tile),
        out_shape=jax.ShapeDtypeStruct((nc, 1), x.dtype),
        grid_spec=pltpu.PrefetchScalarGridSpec(
            num_scalar_prefetch=0,
            grid=grid,
            in_specs=[pl.BlockSpec((row_tile, hw_tile), lambda i, j: (i, j))],
            out_specs=pl.BlockSpec((row_tile, 1), lambda i, j: (i, 0)),
            scratch_shapes=[pltpu.VMEM((row_tile, 1), jnp.float32)],
        ),
        compiler_params=pltpu.CompilerParams(
            dimension_semantics=("parallel", "arbitrary"),
            vmem_limit_bytes=vmem_limit_bytes,
        ),
        cost_estimate=pl.CostEstimate(
            flops=nc * hw,
            transcendentals=0,
            bytes_accessed=nc * hw * itemsize + nc * itemsize,
        ),
    )(x2d)

    return out2d.reshape(n, c, 1, 1)


def _reference(x: jax.Array) -> jax.Array:
    return jnp.mean(x, axis=(2, 3), keepdims=True)


if __name__ == "__main__":
    key = jax.random.PRNGKey(0)
    k0, k1, k2, k3 = jax.random.split(key, 4)

    # Small NCHW input consistent with the module's forward.
    x = jax.random.uniform(k0, (2, 4, 16, 16), dtype=jnp.float32)
    out = global_avg_pool2d(x)
    jax.block_until_ready(out)
    assert out.shape == (2, 4, 1, 1), out.shape
    assert out.dtype == x.dtype, out.dtype
    assert jnp.allclose(out, _reference(x), atol=1e-5, rtol=1e-5), "mismatch (small)"

    # Spec-sized input (1, 3, 224, 224): nc < sublane packing, single grid step.
    x_spec = jax.random.uniform(k1, (1, 3, 224, 224), dtype=jnp.float32)
    out_spec = global_avg_pool2d(x_spec)
    jax.block_until_ready(out_spec)
    assert out_spec.shape == (1, 3, 1, 1), out_spec.shape
    assert jnp.allclose(out_spec, _reference(x_spec), atol=1e-5, rtol=1e-5), "mismatch (224)"

    # nc large enough to split the parallel axis across >= 2 programs, with a
    # ragged row tail (nc = 21).
    x_rows = jax.random.uniform(k2, (3, 7, 20, 24), dtype=jnp.float32)
    out_rows = global_avg_pool2d(x_rows)
    jax.block_until_ready(out_rows)
    assert out_rows.shape == (3, 7, 1, 1), out_rows.shape
    assert jnp.allclose(out_rows, _reference(x_rows), atol=1e-5, rtol=1e-5), "mismatch (rows)"

    # Huge spatial extent: exercises the tiled reduction axis + tail-only masking
    # (looser tolerance: single-pass f32 accumulation vs XLA's tree reduce).
    x_big = jax.random.uniform(k3, (1, 1, 840, 784), dtype=jnp.float32)
    out_big = global_avg_pool2d(x_big)
    jax.block_until_ready(out_big)
    assert out_big.shape == (1, 1, 1, 1), out_big.shape
    assert jnp.allclose(out_big, _reference(x_big), atol=1e-4, rtol=1e-3), "mismatch (big)"

    print("KERNEL_OK")
</pallas_src>

<mosaic_0001>
module attributes {stable_mosaic.version = 11 : i64} {
  func.func @kernel(%arg0: i32, %arg1: i32, %arg2: memref<8x256xf32, #tpu.memory_space<vmem>>, %arg3: memref<8x1xf32, #tpu.memory_space<vmem>>, %arg4: memref<8x1xf32, #tpu.memory_space<vmem>>) attributes {dimension_semantics = [#tpu.dimension_semantics<parallel>, #tpu.dimension_semantics<arbitrary>], iteration_bounds = array<i64: 1, 1>, scalar_prefetch = 0 : i64, scratch_operands = 1 : i64, tpu.core_type = #tpu.core_type<tc>, window_params = [{transform_indices = @transform_0, window_bounds = array<i64: 8, 256>}, {transform_indices = @transform_1, window_bounds = array<i64: 8, 1>}]} {
    %c0_i32 = arith.constant 0 : i32
    %0 = arith.cmpi eq, %arg1, %c0_i32 : i32
    %1 = arith.extui %0 : i1 to i32
    %c0_i32_0 = arith.constant 0 : i32
    %2 = arith.cmpi ne, %1, %c0_i32_0 : i32
    scf.if %2 {
      %cst_8 = arith.constant 0.000000e+00 : f32
      %12 = vector.broadcast %cst_8 : f32 to vector<8x1xf32>
      %c0_9 = arith.constant 0 : index
      %c0_10 = arith.constant 0 : index
      %13 = vector.load %arg4[%c0_9, %c0_10] : memref<8x1xf32, #tpu.memory_space<vmem>>, vector<8x1xf32>
      tpu.vector_store %arg4[%c0_9, %c0_10], %12 {strides = array<i32>} : memref<8x1xf32, #tpu.memory_space<vmem>>, vector<8x1xf32>,
    } else {
    }
    %c0 = arith.constant 0 : index
    %c0_1 = arith.constant 0 : index
    %3 = vector.load %arg2[%c0, %c0_1] : memref<8x256xf32, #tpu.memory_space<vmem>>, vector<8x256xf32>
    %c0_2 = arith.constant 0 : index
    %c0_3 = arith.constant 0 : index
    %4 = vector.load %arg4[%c0_2, %c0_3] : memref<8x1xf32, #tpu.memory_space<vmem>>, vector<8x1xf32>
    %cst = arith.constant dense<0.000000e+00> : vector<8xf32>
    %5 = vector.multi_reduction <add>, %3, %cst [1] : vector<8x256xf32> to vector<8xf32>
    %6 = vector.shape_cast %5 : vector<8xf32> to vector<8x1xf32>
    %7 = arith.addf %4, %6 : vector<8x1xf32>
    %c0_4 = arith.constant 0 : index
    %c0_5 = arith.constant 0 : index
    %8 = vector.load %arg4[%c0_4, %c0_5] : memref<8x1xf32, #tpu.memory_space<vmem>>, vector<8x1xf32>
    tpu.vector_store %arg4[%c0_4, %c0_5], %7 {strides = array<i32>} : memref<8x1xf32, #tpu.memory_space<vmem>>, vector<8x1xf32>,
    %c0_i32_6 = arith.constant 0 : i32
    %9 = arith.cmpi eq, %arg1, %c0_i32_6 : i32
    %10 = arith.extui %9 : i1 to i32
    %c0_i32_7 = arith.constant 0 : i32
    %11 = arith.cmpi ne, %10, %c0_i32_7 : i32
    scf.if %11 {
      %c0_8 = arith.constant 0 : index
      %c0_9 = arith.constant 0 : index
      %12 = vector.load %arg4[%c0_8, %c0_9] : memref<8x1xf32, #tpu.memory_space<vmem>>, vector<8x1xf32>
      %cst_10 = arith.constant 3.906250e-03 : f32
      %13 = vector.broadcast %cst_10 : f32 to vector<8x1xf32>
      %14 = arith.mulf %12, %13 : vector<8x1xf32>
      %c0_11 = arith.constant 0 : index
      %c0_12 = arith.constant 0 : index
      %15 = vector.load %arg3[%c0_11, %c0_12] : memref<8x1xf32, #tpu.memory_space<vmem>>, vector<8x1xf32>
      tpu.vector_store %arg3[%c0_11, %c0_12], %14 {strides = array<i32>} : memref<8x1xf32, #tpu.memory_space<vmem>>, vector<8x1xf32>,
    } else {
    }
    return
  }
  func.func @transform_0(%arg0: i32, %arg1: i32) -> (i32, i32) {
    %c0_i32 = arith.constant 0 : i32
    return %arg0, %arg1 : i32, i32
  }
  func.func @transform_1(%arg0: i32, %arg1: i32) -> (i32, i32) {
    %c0_i32 = arith.constant 0 : i32
    %c0_i32_0 = arith.constant 0 : i32
    return %arg0, %c0_i32 : i32, i32
  }
}

</mosaic_0001>

<bundles_post_ra>
// kernel: tpu_custom_call.1
= control target key start
LH: loop header
LB: loop body
LE: loop exit
PB: predicated region body
PF: predicated region fallthrough
CT: control target
= control target key end

     0   :  { %6 = vsyncpa [#allocation4], 0  ;;  %s70_s6 = smov [#allocation3]   ;;  %s88_s0 = inlined_call_operand.hbm [shape: f32[8,256], index: 0, kind: input, shape index: {}]   ;;  %s89_s1 = inlined_call_operand.vmem [shape: f32[8,1], index: 1, kind: output, shape index: {}]  }
   0x1   :  { %s13_s7 = sshll.u32 %s70_s6, 4  ;;  %s14_s7 = int_to_ptr.vmem [resolvable:$true] %s13_s7 }
   0x2   :  { %s56_s8 = scalar_lea.vmem %s14_s7, 256  ;;  %p61_p1 = scmp.lt.s32.totalorder %s14_s7, %s14_s7 }
   0x3   :  { %p57_p0 = scmp.ne.s32.totalorder %s14_s7, %s56_s8  ;;  %p62_p2 = scmp.lt.s32.totalorder %s56_s8, %s56_s8 }
   0x5   :  { %p63_p3 = por %p62_p2, %p61_p1 }
   0x7   :  { %p64_p4 = pnand %p63_p3, %p57_p0 }
   0x9   :  { %67 = shalt.err (!%p64_p4)
}
   0xa   :  { %16 = dma.hbm_to_vmem [thread:$0]  %s88_s0, 256, %s14_s7, [#allocation4]  }
   0xb   :  { %68 = dma.done.wait [#allocation4], 256  }
   0xc   :  { %69 = vsyncadd [#allocation4], 4294967040  ;;  %vm24_vm0 = vcmask 7168   ;;  %v71_v0 = vmov 0.0   ;;  %v26_v1 = vld [vmem:[#allocation3] sm:$0xff]  ;;  %v27_v2 = vld [vmem:[#allocation3 + $0x8] sm:$0xff] }
   0xd   :  { %25 = vst.msk [vmem:[#allocation2] sm:$0xff] %vm24_vm0, %v71_v0  ;;  %v29_v3 = vadd.f32 %v27_v2, %v26_v1 }
   0xf   :  { %30 = vadd.xlane.f32.xlu0 %v29_v3 }
  0x14   :  { %v28_v4 = vld [vmem:[#allocation2] sm:$0xff] }
  0x98   :  { %v31_v5 = vpop.xlane.xlu0 %30 }
  0x99   :  { %v32_v6 = vadd.f32 %v31_v5, %v28_v4 }
  0x9b   :  { %34 = vst.msk [vmem:[#allocation2] sm:$0xff] %vm24_vm0, %v32_v6 }
  0xa2   :  { %v38_v7 = vld [vmem:[#allocation2] sm:$0xff] }
  0xa3   :  { %v39_v8 = vmul.f32 0.00390625, %v38_v7 }
  0xa5   :  { %40 = vst.msk [vmem:[%s89_s1] sm:$0xff] %vm24_vm0, %v39_v8 }
  0xa6   :  { %45 = vsyncpa [#allocation4], 1 }

</bundles_post_ra>
